<compile_context>
chip_gen: v5e
topology: v5e:2x2
jax: 0.10.0
libtpu: 0.0.40
codegen_flags: <defaults>
</compile_context>

<pallas_src>
import jax
import jax.numpy as jnp
from jax.experimental import pallas as pl
from jax.experimental.pallas import tpu as pltpu


def _round_up(x, m):
    return ((x + m - 1) // m) * m


def _pack_params(params):
    """Pack (w1,b1,w2,b2,w3,b3) into one small f32 slab (pre-transposed so the
    kernel computes W.T @ x); a single resident operand instead of six."""
    w1, b1, w2, b2, w3, b3 = params
    Cin, c1 = w1.shape
    c2 = w2.shape[1]
    Cout = w3.shape[1]
    R = max(c1, c2, Cout)
    Ctot = Cin + 1 + c1 + 1 + c2 + 1
    o1 = Cin + 1
    o2 = o1 + c1 + 1
    packed = jnp.zeros((R, Ctot), jnp.float32)
    packed = packed.at[:c1, 0:Cin].set(jnp.transpose(w1).astype(jnp.float32))
    packed = packed.at[:c1, Cin].set(b1.astype(jnp.float32))
    packed = packed.at[:c2, o1:o1 + c1].set(jnp.transpose(w2).astype(jnp.float32))
    packed = packed.at[:c2, o1 + c1].set(b2.astype(jnp.float32))
    packed = packed.at[:Cout, o2:o2 + c2].set(jnp.transpose(w3).astype(jnp.float32))
    packed = packed.at[:Cout, o2 + c2].set(b3.astype(jnp.float32))
    return packed, (Cin, c1, c2, Cout)


def _make_kernel(Cin, c1, c2, Cout):
    o1 = Cin + 1
    o2 = o1 + c1 + 1

    def kernel(x_ref, u_ref, w_ref, o_ref):
        # x_ref: (Cin, tm); u_ref / o_ref: (Cout, tm); w_ref: resident slab.
        x = x_ref[...].astype(jnp.float32)
        w = w_ref[...]
        w1 = w[:c1, 0:Cin]
        b1 = w[:c1, Cin:Cin + 1]
        w2 = w[:c2, o1:o1 + c1]
        b2 = w[:c2, o1 + c1:o1 + c1 + 1]
        w3 = w[:Cout, o2:o2 + c2]
        b3 = w[:Cout, o2 + c2:o2 + c2 + 1]
        h = jnp.maximum(jnp.dot(w1, x, preferred_element_type=jnp.float32) + b1, 0.0)
        h = jnp.maximum(jnp.dot(w2, h, preferred_element_type=jnp.float32) + b2, 0.0)
        h = jnp.dot(w3, h, preferred_element_type=jnp.float32) + b3
        o_ref[...] = (h + u_ref[...].astype(jnp.float32)).astype(o_ref.dtype)

    return kernel


def update_resnet_pallas(concat_f, u, params, *, tm=32768):
    """concat_f: (B, Cin, H, W) NCHW; u: (B, Cout, H, W) NCHW. Returns NCHW."""
    B, Cin, H, W = concat_f.shape
    packed, (Cin_p, c1, c2, Cout) = _pack_params(params)
    assert Cin_p == Cin
    assert u.shape == (B, Cout, H, W)

    HW = H * W
    x3 = concat_f.reshape(B, Cin, HW)       # free reshape, no transpose
    u3 = u.reshape(B, Cout, HW)

    # Pixel-tile selection (no wrapper-side padding; last tile may be ragged):
    #  * lane dim is always a multiple of 128,
    #  * clamp to image size and balance tiles so the tail isn't tiny,
    #  * with B == 1 force >= 2 pixel tiles so megacore sharding isn't a no-op.
    tm_cap = max(128, _round_up(min(tm, HW), 128))
    n_tiles = pl.cdiv(HW, tm_cap)
    if B == 1 and HW > 128:
        n_tiles = max(n_tiles, 2)
    tm_eff = _round_up(pl.cdiv(HW, n_tiles), 128)
    n_tiles = pl.cdiv(HW, tm_eff)
    grid = (B, n_tiles)

    x_spec = pl.BlockSpec((pl.Squeezed(), Cin, tm_eff), lambda b, i: (b, 0, i))
    u_spec = pl.BlockSpec((pl.Squeezed(), Cout, tm_eff), lambda b, i: (b, 0, i))
    o_spec = pl.BlockSpec((pl.Squeezed(), Cout, tm_eff), lambda b, i: (b, 0, i))
    w_spec = pl.BlockSpec(packed.shape, lambda b, i: (0, 0))      # resident

    itemsize = jnp.dtype(concat_f.dtype).itemsize
    M = B * HW
    flops = 2 * M * (Cin * c1 + c1 * c2 + c2 * Cout)
    bytes_accessed = M * (Cin + 2 * Cout) * itemsize + int(packed.size) * 4

    out3 = pl.pallas_call(
        _make_kernel(Cin, c1, c2, Cout),
        out_shape=jax.ShapeDtypeStruct((B, Cout, HW), concat_f.dtype),
        grid_spec=pltpu.PrefetchScalarGridSpec(
            num_scalar_prefetch=0,
            grid=grid,
            in_specs=[x_spec, u_spec, w_spec],
            out_specs=o_spec,
        ),
        compiler_params=pltpu.CompilerParams(
            dimension_semantics=("parallel", "parallel"),
            vmem_limit_bytes=32 * 1024 * 1024),
        cost_estimate=pl.CostEstimate(
            flops=flops, transcendentals=0, bytes_accessed=bytes_accessed),
    )(x3, u3, packed)

    return out3.reshape(B, Cout, H, W)


def init_params(key, in_channel, out_channel, dtype=jnp.float32):
    """Deterministic synthetic params matching the nn.Conv2d(.., 1) shapes.
    Conv2d weight (Co, Ci, 1, 1) is stored here as (Ci, Co) matmul weight."""
    c1, c2 = in_channel // 2, in_channel // 4
    k1, k2, k3 = jax.random.split(key, 3)
    w1 = jax.random.normal(k1, (in_channel, c1), dtype) * 0.1
    b1 = jnp.linspace(-0.1, 0.1, c1, dtype=dtype)
    w2 = jax.random.normal(k2, (c1, c2), dtype) * 0.1
    b2 = jnp.linspace(-0.1, 0.1, c2, dtype=dtype)
    w3 = jax.random.normal(k3, (c2, out_channel), dtype) * 0.1
    b3 = jnp.linspace(-0.1, 0.1, out_channel, dtype=dtype)
    return (w1, b1, w2, b2, w3, b3)


def _reference(concat_f, u, params):
    """Pure-JAX reference of the PyTorch forward."""
    w1, b1, w2, b2, w3, b3 = params
    x = jnp.transpose(concat_f, (0, 2, 3, 1))            # NHWC
    h = jnp.maximum(x @ w1 + b1, 0.0)
    h = jnp.maximum(h @ w2 + b2, 0.0)
    h = h @ w3 + b3
    out = h + jnp.transpose(u, (0, 2, 3, 1))
    return jnp.transpose(out, (0, 3, 1, 2))               # NCHW


if __name__ == "__main__":
    key = jax.random.PRNGKey(0)
    k_x, k_u, k_p = jax.random.split(key, 3)

    B, Cin, Cout, H, W = 2, 16, 4, 16, 16
    params = init_params(k_p, Cin, Cout)

    # 1) f32, tile-multiple image.
    concat_f = jax.random.normal(k_x, (B, Cin, H, W), jnp.float32)
    u = jax.random.normal(k_u, (B, Cout, H, W), jnp.float32)
    out = jax.block_until_ready(update_resnet_pallas(concat_f, u, params))
    ref = _reference(concat_f, u, params)
    assert out.shape == (B, Cout, H, W)
    assert jnp.allclose(out, ref, atol=1e-5, rtol=1e-5), "mismatch (f32)"

    # 2) Ragged pixel axis (HW=100): masked boundary block, no wrapper pad/slice.
    H2 = W2 = 10
    x2 = jax.random.normal(k_x, (B, Cin, H2, W2), jnp.float32)
    u2 = jax.random.normal(k_u, (B, Cout, H2, W2), jnp.float32)
    out2 = jax.block_until_ready(update_resnet_pallas(x2, u2, params))
    assert jnp.allclose(out2, _reference(x2, u2, params), atol=1e-5, rtol=1e-5), \
        "mismatch (ragged)"

    # 3) Multi-tile pixel axis with a ragged tail (HW=400, tm forced small).
    H3 = W3 = 20
    x3 = jax.random.normal(k_x, (B, Cin, H3, W3), jnp.float32)
    u3 = jax.random.normal(k_u, (B, Cout, H3, W3), jnp.float32)
    out3 = jax.block_until_ready(update_resnet_pallas(x3, u3, params, tm=128))
    assert jnp.allclose(out3, _reference(x3, u3, params), atol=1e-5, rtol=1e-5), \
        "mismatch (multi-tile)"

    # 4) B == 1: pixel axis is split into >= 2 tiles (megacore-friendly).
    x4 = jax.random.normal(k_x, (1, Cin, H, W), jnp.float32)
    u4 = jax.random.normal(k_u, (1, Cout, H, W), jnp.float32)
    out4 = jax.block_until_ready(update_resnet_pallas(x4, u4, params))
    assert jnp.allclose(out4, _reference(x4, u4, params), atol=1e-5, rtol=1e-5), \
        "mismatch (B=1)"

    # 5) bf16 activations (weights f32, f32 accumulation): half the HBM bytes.
    xb = concat_f.astype(jnp.bfloat16)
    ub = u.astype(jnp.bfloat16)
    outb = jax.block_until_ready(update_resnet_pallas(xb, ub, params))
    refb = _reference(xb.astype(jnp.float32), ub.astype(jnp.float32), params)
    assert outb.dtype == jnp.bfloat16
    assert jnp.allclose(outb.astype(jnp.float32), refb, atol=0.1, rtol=0.1), \
        "mismatch (bf16)"

    print("KERNEL_OK")
</pallas_src>

<mosaic_0001>
module attributes {stable_mosaic.version = 11 : i64} {
  func.func @kernel(%arg0: i32, %arg1: i32, %arg2: memref<1x16x256xf32, #tpu.memory_space<vmem>>, %arg3: memref<1x4x256xf32, #tpu.memory_space<vmem>>, %arg4: memref<8x31xf32, #tpu.memory_space<vmem>>, %arg5: memref<1x4x256xf32, #tpu.memory_space<vmem>>) attributes {dimension_semantics = [#tpu.dimension_semantics<parallel>, #tpu.dimension_semantics<parallel>], iteration_bounds = array<i64: 2, 1>, scalar_prefetch = 0 : i64, scratch_operands = 0 : i64, tpu.core_type = #tpu.core_type<tc>, window_params = [{transform_indices = @transform_0, window_bounds = array<i64: 1, 16, 256>}, {transform_indices = @transform_1, window_bounds = array<i64: 1, 4, 256>}, {pipeline_mode = #tpu.pipeline_mode<synchronous>, transform_indices = @transform_2, window_bounds = array<i64: 8, 31>}, {transform_indices = @transform_3, window_bounds = array<i64: 1, 4, 256>}]} {
    %c0 = arith.constant 0 : index
    %c0_0 = arith.constant 0 : index
    %c0_1 = arith.constant 0 : index
    %0 = vector.load %arg2[%c0, %c0_0, %c0_1] : memref<1x16x256xf32, #tpu.memory_space<vmem>>, vector<1x16x256xf32>
    %1 = vector.shape_cast %0 : vector<1x16x256xf32> to vector<16x256xf32>
    %c0_2 = arith.constant 0 : index
    %c0_3 = arith.constant 0 : index
    %2 = vector.load %arg4[%c0_2, %c0_3] : memref<8x31xf32, #tpu.memory_space<vmem>>, vector<8x31xf32>
    %3 = vector.extract_strided_slice %2 {offsets = [0, 0], sizes = [8, 16], strides = [1, 1]} : vector<8x31xf32> to vector<8x16xf32>
    %4 = vector.extract_strided_slice %2 {offsets = [0, 16], sizes = [8, 1], strides = [1, 1]} : vector<8x31xf32> to vector<8x1xf32>
    %5 = vector.extract_strided_slice %2 {offsets = [0, 17], sizes = [4, 8], strides = [1, 1]} : vector<8x31xf32> to vector<4x8xf32>
    %6 = vector.extract_strided_slice %2 {offsets = [0, 25], sizes = [4, 1], strides = [1, 1]} : vector<8x31xf32> to vector<4x1xf32>
    %7 = vector.extract_strided_slice %2 {offsets = [0, 26], sizes = [4, 4], strides = [1, 1]} : vector<8x31xf32> to vector<4x4xf32>
    %8 = vector.extract_strided_slice %2 {offsets = [0, 30], sizes = [4, 1], strides = [1, 1]} : vector<8x31xf32> to vector<4x1xf32>
    %cst = arith.constant dense<0.000000e+00> : vector<8x256xf32>
    %9 = tpu.matmul %3, %1, %cst {dimension_numbers = #tpu.dot_dimension_numbers<[1], [0], [0], [1], [0, 0, 1, 1], [], []>} : vector<8x16xf32>, vector<16x256xf32>, vector<8x256xf32> -> vector<8x256xf32>
    %10 = vector.broadcast %4 : vector<8x1xf32> to vector<8x256xf32>
    %11 = arith.addf %9, %10 : vector<8x256xf32>
    %cst_4 = arith.constant 0.000000e+00 : f32
    %12 = vector.broadcast %cst_4 : f32 to vector<8x256xf32>
    %13 = arith.maximumf %11, %12 : vector<8x256xf32>
    %cst_5 = arith.constant dense<0.000000e+00> : vector<4x256xf32>
    %14 = tpu.matmul %5, %13, %cst_5 {dimension_numbers = #tpu.dot_dimension_numbers<[1], [0], [0], [1], [0, 0, 1, 1], [], []>} : vector<4x8xf32>, vector<8x256xf32>, vector<4x256xf32> -> vector<4x256xf32>
    %15 = vector.broadcast %6 : vector<4x1xf32> to vector<4x256xf32>
    %16 = arith.addf %14, %15 : vector<4x256xf32>
    %cst_6 = arith.constant 0.000000e+00 : f32
    %17 = vector.broadcast %cst_6 : f32 to vector<4x256xf32>
    %18 = arith.maximumf %16, %17 : vector<4x256xf32>
    %cst_7 = arith.constant dense<0.000000e+00> : vector<4x256xf32>
    %19 = tpu.matmul %7, %18, %cst_7 {dimension_numbers = #tpu.dot_dimension_numbers<[1], [0], [0], [1], [0, 0, 1, 1], [], []>} : vector<4x4xf32>, vector<4x256xf32>, vector<4x256xf32> -> vector<4x256xf32>
    %20 = vector.broadcast %8 : vector<4x1xf32> to vector<4x256xf32>
    %21 = arith.addf %19, %20 : vector<4x256xf32>
    %c0_8 = arith.constant 0 : index
    %c0_9 = arith.constant 0 : index
    %c0_10 = arith.constant 0 : index
    %22 = vector.load %arg3[%c0_8, %c0_9, %c0_10] : memref<1x4x256xf32, #tpu.memory_space<vmem>>, vector<1x4x256xf32>
    %23 = vector.shape_cast %22 : vector<1x4x256xf32> to vector<4x256xf32>
    %24 = arith.addf %21, %23 : vector<4x256xf32>
    %c0_11 = arith.constant 0 : index
    %c0_12 = arith.constant 0 : index
    %c0_13 = arith.constant 0 : index
    %25 = vector.load %arg5[%c0_11, %c0_12, %c0_13] : memref<1x4x256xf32, #tpu.memory_space<vmem>>, vector<1x4x256xf32>
    %26 = vector.shape_cast %25 : vector<1x4x256xf32> to vector<4x256xf32>
    %27 = vector.shape_cast %24 : vector<4x256xf32> to vector<1x4x256xf32>
    tpu.vector_store %arg5[%c0_11, %c0_12, %c0_13], %27 {strides = array<i32>} : memref<1x4x256xf32, #tpu.memory_space<vmem>>, vector<1x4x256xf32>,
    return
  }
  func.func @transform_0(%arg0: i32, %arg1: i32) -> (i32, i32, i32) {
    %c0_i32 = arith.constant 0 : i32
    %c0_i32_0 = arith.constant 0 : i32
    return %arg0, %c0_i32, %arg1 : i32, i32, i32
  }
  func.func @transform_1(%arg0: i32, %arg1: i32) -> (i32, i32, i32) {
    %c0_i32 = arith.constant 0 : i32
    %c0_i32_0 = arith.constant 0 : i32
    return %arg0, %c0_i32, %arg1 : i32, i32, i32
  }
  func.func @transform_2(%arg0: i32, %arg1: i32) -> (i32, i32) {
    %c0_i32 = arith.constant 0 : i32
    %c0_i32_0 = arith.constant 0 : i32
    %c0_i32_1 = arith.constant 0 : i32
    return %c0_i32, %c0_i32_0 : i32, i32
  }
  func.func @transform_3(%arg0: i32, %arg1: i32) -> (i32, i32, i32) {
    %c0_i32 = arith.constant 0 : i32
    %c0_i32_0 = arith.constant 0 : i32
    return %arg0, %c0_i32, %arg1 : i32, i32, i32
  }
}

</mosaic_0001>

<bundles_post_ra>
// kernel: tpu_custom_call.1
= control target key start
LH: loop header
LB: loop body
LE: loop exit
PB: predicated region body
PF: predicated region fallthrough
CT: control target
= control target key end

     0   :  { %s1087_s0 = inlined_call_operand.hbm [shape: f32[2,16,256], index: 0, kind: input, shape index: {}]   ;;  %s1088_s1 = inlined_call_operand.hbm [shape: f32[2,4,256], index: 1, kind: input, shape index: {}]   ;;  %s1089_s2 = inlined_call_operand.hbm [shape: f32[8,31], index: 2, kind: input, shape index: {}]   ;;  %s1090_s3 = inlined_call_operand.hbm [shape: f32[2,4,256], index: 3, kind: output, shape index: {}]  }
   0x1   :  { %1094 = sst [smem:[#allocation16_spill]] %s1089_s2 }
   0x2   :  { %8 = vsyncpa [#allocation3], 0 }
   0x3   :  { %10 = vsyncpa [#allocation3 + $0x1], 0 }
   0x4   :  { %11 = vsyncpa [#allocation6], 0 }
   0x5   :  { %13 = vsyncpa [#allocation6 + $0x1], 0 }
   0x6   :  { %14 = vsyncpa [#allocation4], 0 }
   0x7   :  { %16 = vsyncpa [#allocation4 + $0x1], 0  ;;  %s916_s12 = smov 0   ;;  %s918_s13 = smov 0  }
   0x8   :  { %s920_s14 = smov 0   ;;  %s922_s15 = smov 0  }
   0x9   :  { %s924_s16 = smov 0   ;;  %s926_s17 = smov 0  }
   0xa LB: > { %1095 = sst [smem:[#allocation13_spill]] %s866_s12  ;;  %s947_s18 = sadd.s32 4294967295, %s886_s17   ;;  %s886_s17 = sphi %s926_s17, %s22_s17   ;;  %s882_s16 = sphi %s924_s16, %s1112_s16   ;;  %s878_s15 = sphi %s922_s15, %s1111_s15   ;;  %s874_s14 = sphi %s920_s14, %s1110_s14   ;;  %s870_s13 = sphi %s918_s13, %s1109_s13   ;;  %s866_s12 = sphi %s916_s12, %s1108_s12  }
   0xb   : > { %s586_s19 = sadd.s32 4294967294, %s886_s17   ;;  %s43_s20 = sadd.s32 1, %s874_s14 }
   0xc   : > { %p50_p0 = scmp.ne.s32.totalorder %s874_s14, %s870_s13  ;;  %p51_p1 = scmp.eq.s32.totalorder %s886_s17, 0 }
   0xd   : > { %p56_p2 = scmp.ne.s32.totalorder %s870_s13, %s866_s12  ;;  %p57_p3 = scmp.eq.s32.totalorder %s947_s18, 0 }
   0xe   : > { %p131_p4 = scmp.eq.s32.totalorder %s947_s18, 1  ;;  %p958_p5 = por %p51_p1, %p50_p0 }
   0xf   : > { %p137_p6 = scmp.eq.s32.totalorder %s586_s19, 1  ;;  %p964_p7 = por %p57_p3, %p56_p2 }
  0x10   : > { %p968_p8 = por %p131_p4, %p50_p0  ;;  %p587_p10 = scmp.ge.s32.totalorder %s886_s17, 1 }
  0x11   : > { %p972_p9 = por %p137_p6, %p56_p2  ;;  %p144_p11 = scmp.lt.s32.totalorder %s886_s17, 3 }
  0x12   : > { %s1101_s2 = sld [smem:[#allocation16_spill]]  ;;  %s888_s29 = smov [#allocation7]  }
  0x13   : > { %s1099_s24 = scalar_select %p972_p9, 1, 0 }
  0x14   : > { %p981_p12 = pnand %p587_p10, %p144_p11  ;;  %s158_s30 = sshll.u32 %s888_s29, 4  ;;  %s159_s30 = int_to_ptr.vmem [resolvable:$true] %s158_s30 }
  0x15   : > { %1100 = sst [smem:[#allocation14_spill]] %s1099_s24  ;;  %p589_p13 = scmp.ge.s32.totalorder %s886_s17, 2 }
  0x16   : > { %p627_p0 = pneg %p981_p12  ;;  %p643_p1 = scmp.lt.s32.totalorder %s886_s17, 2 }
  0x17   : > { %s34_s5 = sadd.s32 1, %s882_s16  ;;  %s169_s6 = sand.u32 1, %s874_s14  }
  0x18   : > { %s156_s27 = sshll.u32 %s1101_s2, 4  ;;  %p628_p2 = pnand %p627_p0, %p57_p3  ;;  %s157_s27 = int_to_ptr.hbm [resolvable:$true] %s156_s27 }
  0x19   : > { %p993_p4 = pnand %p643_p1, %p958_p5  ;;  %p36_p6 = scmp.ge.s32.totalorder %s34_s5, 2 }
  0x1a   : > { %630 = dma.hbm_to_vmem [thread:$0]  (!%p628_p2), %s157_s27, 128, %s159_s30, [#allocation6]  }
  0x1b   : > { %s1114_s5 = smov (%p36_p6, %s34_s5), 0  ;;  %s590_s7 = sshll.u32 %s169_s6, 5 }
  0x1c   : > { %1104 = sst [smem:[#allocation15_spill]] %s1114_s5  ;;  %s38_s8 = ssub.s32 %s882_s16, %s1114_s5 }
  0x1d   : > { %p41_p10 = scmp.eq.s32.totalorder %s38_s8, 0  ;;  %s614_s9 = sshll.u32 %s882_s16, 5 }
  0x1e   : > { %s180_s19 = scalar_lea.hbm %s1087_s0, %s614_s9  ;;  %s173_s21 = scalar_lea.vmem [#allocation2], %s590_s7 }
  0x1f   : > { %s183_s25 = sshll.u32 %s173_s21, 4  ;;  %s181_s27 = sshll.u32 %s180_s19, 4  ;;  %s184_s25 = int_to_ptr.vmem [resolvable:$true] %s183_s25  ;;  %s182_s27 = int_to_ptr.hbm [resolvable:$true] %s181_s27 }
  0x20   : > { %s1010_s26 = scalar_select %p41_p10, %s874_s14, %s43_s20  }
  0x21   : > { %s193_s29 = sand.u32 1, %s886_s17   ;;  %s170_s30 = scalar_lea.sflag [#allocation3], %s169_s6 }
  0x22   : > { %s889_s2 = smov 256   ;;  %s890_s5 = smov 16  }
  0x23   : > { %634 = dma.hbm_to_vmem [thread:$0]  (!%p993_p4), %s182_s27, 512, %s184_s25, %s170_s30, %s889_s2, %s889_s2, %s890_s5  }
  0x24   : > { %s593_s8 = sshll.u32 %s169_s6, 3  ;;  %s615_s24 = sshll.u32 %s882_s16, 3 }
  0x25   : > { %s204_s7 = scalar_lea.hbm %s1088_s1, %s615_s24  ;;  %s197_s9 = scalar_lea.vmem [#allocation5], %s593_s8 }
  0x26   : > { %s208_s11 = sshll.u32 %s197_s9, 4  ;;  %s206_s20 = sshll.u32 %s204_s7, 4  ;;  %s209_s11 = int_to_ptr.vmem [resolvable:$true] %s208_s11  ;;  %s207_s20 = int_to_ptr.hbm [resolvable:$true] %s206_s20 }
  0x27   : > { %s194_s19 = scalar_lea.sflag [#allocation6], %s193_s29  ;;  %217 = sbr.rel (%p981_p12) target bundleno = 465 (0x1d1), region = 32 }
  0x28   : > { %637 = dma.hbm_to_vmem [thread:$0]  (!%p993_p4), %s207_s20, 128, %s209_s11, %s194_s19  }
  0x29   : > { %s1024_s2 = sand.u32 (!%p981_p12), 1, %s870_s13  }
  0x2a   : > { %s597_s5 = sshll.u32 (!%p981_p12), %s1024_s2, 5  ;;  %s220_s12 = scalar_lea.sflag (!%p981_p12), [#allocation3], %s1024_s2 }
  0x2b   : > { %s223_s24 = scalar_lea.vmem (!%p981_p12), [#allocation2], %s597_s5 }
  0x2c   : > { %849 = dma.done.wait (%p964_p7), %s220_s12, 512  }
  0x2d   : > { %851 = vsyncadd (%p964_p7), %s220_s12, 4294966784  ;;  %s229_s28 = sand.u32 1, %s947_s18   ;;  %s598_s4 = sshll.u32 %s1024_s2, 3 }
  0x2e   : > { %s230_s6 = scalar_lea.sflag [#allocation6], %s229_s28  ;;  %s233_s21 = scalar_lea.vmem [#allocation5], %s598_s4 }
  0x2f   : > { %853 = dma.done.wait (%p964_p7), %s230_s6, 128  }
  0x30   : > { %855 = vsyncadd (%p964_p7), %s230_s6, 4294967168 }
  0x31   : > { %857 = dma.done.wait (%p57_p3), [#allocation6], 128  }
  0x32   : > { %859 = vsyncadd (%p57_p3), [#allocation6], 4294967168  ;;  %v891_v0 = vmov 16   ;;  %v432_v1 = vld [vmem:[%s233_s21] sm:$0xff]  ;;  %v272_v2 = vld [vmem:[%s223_s24 + $0x10] sm:$0xff]  ;;  %vm280_vm0 = vcmask 130048  }
  0x33   : > { %702 = vset.pattern.permute.xlu0 %v891_v0  ;;  %v273_v3 = vld [vmem:[%s223_s24 + $0x18] sm:$0xff]  ;;  %434 = vst [vmem:[#allocation1] ss:$2 sm:$0xff] %v432_v1  ;;  %297 = vmatpush.msra.mxu0 %v272_v2  ;;  %v270_v4 = vld [vmem:[%s223_s24] sm:$0xff]  ;;  %v271_v5 = vld [vmem:[%s223_s24 + $0x8] sm:$0xff]  ;;  %s892_s22 = smov 111  }
  0x34   : > { %317 = vmatpush.msra.mxu1 %v273_v3  ;;  %v274_v6 = vld [vmem:[#allocation7] sm:$0xff]  ;;  %v893_v7 = vmov 25   ;;  %s894_s18 = smov 102   ;;  %vm331_vm1 = vcmask 64512   ;;  %v895_v16 = vmov 30   ;;  %vm385_vm2 = vcmask 1043456  }
  0x35   : > { %277 = vperm.xlu0 %702, %v274_v6   ;;  %298 = vmatpush.msra.mxu0 %v270_v4  ;;  %vm382_vm3 = vcmask 31744   ;;  %s616_s25 = sshll.u32 %s878_s15, 3  ;;  %s266_s8 = scalar_lea.vmem [#allocation8], %s598_s4 }
  0x36   : > { %318 = vmatpush.msra.mxu1 %v271_v5  ;;  %601 = vmatmul.msk.f32.vlgmr.msra.gmra.mxu0 %vm280_vm0, %v274_v6  ;;  %s461_s30 = scalar_lea.hbm %s1090_s3, %s616_s25  ;;  %s463_s10 = sshll.u32 %s266_s8, 4  ;;  %s464_s10 = int_to_ptr.vmem [resolvable:$true] %s463_s10 }
  0x37   : > { %602 = vmatmul.msk.f32.vlgmr.msra.gmra.mxu1 %vm280_vm0, %v274_v6  ;;  %703 = vset.pattern.permute.xlu1 %v893_v7  ;;  %s465_s7 = sshll.u32 %s461_s30, 4  ;;  %s448_s15 = scalar_lea.sflag [#allocation4], %s1024_s2  ;;  %s466_s7 = int_to_ptr.hbm [resolvable:$true] %s465_s7 }
  0x38   : > { %326 = vperm.xlu1 %703, %v274_v6   ;;  %704 = vset.pattern.permute.xlu2 %v895_v16  ;;  %s810_s9 = sshra.s32 %s466_s7, 4  ;;  %s816_s5 = scalar_lea.hbm %s1090_s3, 16  ;;  %s811_s9 = int_to_ptr.hbm [resolvable:$true] %s810_s9 }
  0x39   : > { %377 = vperm.xlu2 %704, %v274_v6   ;;  %s812_s11 = scalar_lea.hbm %s811_s9, 8  ;;  %p817_p11 = scmp.lt.s32.totalorder %s811_s9, %s1090_s3 }
  0x3a   : > { %v436_v27 = vld.sshfl [vmem:[#allocation1 + $0x8] sm:$0xff pattern:$0x75316420]  ;;  %v435_v31 = vld.sshfl [vmem:[#allocation1] sm:$0xff pattern:$0x75316420]  ;;  %p813_p3 = scmp.ne.s32.totalorder %s811_s9, %s812_s11  ;;  %p818_p12 = scmp.lt.s32.totalorder %s816_s5, %s812_s11 }
  0x3c   : > { %p814_p5 = pnand %p813_p3, %p968_p8  ;;  %p819_p0 = por %p818_p12, %p817_p11 }
  0x3d   : > { %329 = vrot.lane.b32.xlu0 %v274_v6, %s892_s22 }
  0x3e   : > { %705 = vset.pattern.permute.xlu0 %v895_v16  ;;  %p815_p7 = pneg %p814_p5 }
  0x40   : > { %380 = vrot.lane.b32.xlu1 %v274_v6, %s894_s18  ;;  %p820_p1 = pnand %p819_p0, %p815_p7 }
  0x93   : > { %v378_v25 = vpop.permute.xlu2 %377 }
  0xa7   : > { %v278_v8 = vpop.permute.xlu0 %277 }
  0xaa   : > { %v327_v17 = vpop.permute.xlu1 %326 }
  0xaf   : > { %v330_v13 = vpop.permute.xlu0 %329 }
  0xb2   : > { %v381_v24 = vpop.permute.xlu1 %380 }
  0xb3   : > { %v300_v9 = vpop.f32.mrf.mxu0 }
  0xb4   : > { %v320_v10 = vpop.f32.mrf.mxu1  ;;  %v301_v11 = vadd.f32 %v300_v9, %v278_v8 }
  0xb5   : > { %v321_v12 = vadd.f32 %v320_v10, %v278_v8 }
  0xb6   : > { %v323_v14 = vmax.f32 %v301_v11, 0.0 }
  0xb7   : > { %v324_v15 = vmax.f32 %v321_v12, 0.0 }
  0xb8   : > { %349 = vmatpush.msra.mxu2 %v323_v14 }
  0xb9   : > { %369 = vmatpush.msra.mxu3 %v324_v15  ;;  %603 = vmatmul.msk.f32.vlgmr.msra.gmra.mxu2 %vm331_vm1, %v330_v13 }
  0xba   : > { %604 = vmatmul.msk.f32.vlgmr.msra.gmra.mxu3 %vm331_vm1, %v330_v13 }
 0x13c   : > { %v351_v18 = vpop.f32.mrf.mxu2 }
 0x13d   : > { %v371_v19 = vpop.f32.mrf.mxu3  ;;  %v352_v20 = vadd.f32 %v351_v18, %v327_v17 }
 0x13e   : > { %v372_v21 = vadd.f32 %v371_v19, %v327_v17 }
 0x13f   : > { %v374_v22 = vmax.f32 %v352_v20, 0.0 }
 0x140   : > { %v375_v23 = vmax.f32 %v372_v21, 0.0 }
 0x141   : > { %605 = vmatpush.msk.msrb.mxu2 %vm385_vm2, %v374_v22 }
 0x142   : > { %607 = vmatpush.msk.msrb.mxu3 %vm385_vm2, %v375_v23  ;;  %606 = vmatmul.msk.f32.vlgmr.msrb.gmra.mxu2 %vm382_vm3, %v381_v24 }
 0x143   : > { %608 = vmatmul.msk.f32.vlgmr.msrb.gmra.mxu3 %vm382_vm3, %v381_v24 }
 0x1c5   : > { %v409_v28 = vpop.f32.mrf.mxu2 }
 0x1c6   : > { %v429_v26 = vpop.f32.mrf.mxu3  ;;  %v410_v30 = vadd.f32 %v409_v28, %v378_v25 }
 0x1c7   : > { %v430_v29 = vadd.f32 %v429_v26, %v378_v25 }
 0x1c8   : > { %v439_v34 = vadd.f32 %v435_v31, %v410_v30 }
 0x1c9   : > { %v440_v32 = vadd.f32 %v436_v27, %v430_v29 }
 0x1cb   : > { %v443_v33 = vrot.slane %v440_v32, 4 }
 0x1cd   : > { %v444_v35 = vsel %vm385_vm2, %v439_v34, %v443_v33 }
 0x1ce   : > { %446 = vst [vmem:[%s266_s8] sm:$0xff] %v444_v35 }
 0x1cf   : > { %823 = shalt.err (!%p820_p1)
}
 0x1d0   : > { %625 = dma.vmem_to_hbm [thread:$0]  (%p968_p8), %s464_s10, 128, %s466_s7, %s448_s15  }
 0x1d1 PF: > { %s1105_s2 = sld [smem:[#allocation13_spill]]  ;;  %p639_p2 = pnand %p589_p13, %p972_p9 }
 0x1d3   : > { %p640_p4 = pneg %p639_p2 }
 0x1d7   : > { %s477_s4 = sand.u32 1, %s1105_s2  }
 0x1d8   : > { %s478_s6 = scalar_lea.sflag [#allocation4], %s477_s4 }
 0x1d9   : > { %861 = dma.done.wait (%p640_p4), %s478_s6, 128  }
 0x1da   : > { %863 = vsyncadd (%p640_p4), %s478_s6, 4294967168  ;;  %s22_s17 = sadd.s32 1, %s886_s17   ;;  %s1107_s23 = sld [smem:[#allocation15_spill]] }
 0x1db   : > { %p19_p6 = scmp.ge.s32.totalorder %s22_s17, 4   ;;  %s1108_s12 = smov %s870_s13 }
 0x1dc   : > { %s1109_s13 = smov %s874_s14  ;;  %s1110_s14 = smov %s1010_s26 }
 0x1dd   : > { %s1111_s15 = smov %s882_s16  ;;  %21 = sbr.rel (!%p19_p6) target bundleno = 10 (0xa), region = 94 }
 0x1e0   : > { %s1112_s16 = smov %s1107_s23 }
 0x1e2   :  { %484 = vsyncpa [#allocation3], 1 }
 0x1e3   :  { %486 = vsyncpa [#allocation3 + $0x1], 1 }
 0x1e4   :  { %487 = vsyncpa [#allocation6], 1 }
 0x1e5   :  { %489 = vsyncpa [#allocation6 + $0x1], 1 }
 0x1e6   :  { %490 = vsyncpa [#allocation4], 1 }
 0x1e7   :  { %492 = vsyncpa [#allocation4 + $0x1], 1 }

</bundles_post_ra>
